<compile_context>
chip_gen: v5e
topology: v5e:2x2
jax: 0.10.0
libtpu: 0.0.40
codegen_flags: <defaults>
</compile_context>

<pallas_src>
import jax
import jax.numpy as jnp
from jax.experimental import pallas as pl
from jax.experimental.pallas import tpu as pltpu


def _conv1x1_kernel(w_ref, x_ref, o_ref):
    # w_ref: (Cout, Cin) VMEM-resident weight.
    # x_ref: (Nb, Cin, T) input block; o_ref: (Nb, Cout, T) output block.
    w = w_ref[...]
    for b in range(x_ref.shape[0]):  # Nb is static (block shape) -> unrolled
        o_ref[b] = jnp.dot(
            w, x_ref[b], preferred_element_type=jnp.float32
        ).astype(o_ref.dtype)


def conv1x1_pallas(
    x_nchw,
    weight_oihw,
    *,
    vmem_budget_bytes=12 * 1024 * 1024,
    compute_dtype=None,
):
    """1x1 conv, stride 1, no bias.

    x_nchw:      (N, Cin, H, W) float32
    weight_oihw: (Cout, Cin, 1, 1) float32 (PyTorch layout)
    returns      (N, Cout, H, W) float32
    """
    n, cin, h, w = x_nchw.shape
    cout = weight_oihw.shape[0]
    hw = h * w

    # Free reshapes only (no data movement / transposes).
    x_flat = x_nchw.reshape(n, cin, hw)
    w_mat = weight_oihw.reshape(cout, cin)

    # TODO(synk): pass compute_dtype=jnp.bfloat16 to halve HBM traffic (f32
    # accumulation & f32 output kept); default stays f32 to match the module.
    if compute_dtype is not None:
        x_flat = x_flat.astype(compute_dtype)
        w_mat = w_mat.astype(compute_dtype)

    itemsize = jnp.dtype(x_flat.dtype).itemsize
    # Bytes per spatial lane of (input + output), double-buffered by Pallas.
    bytes_per_lane = (cin + cout) * itemsize * 2
    per_image_bytes = hw * bytes_per_lane

    if per_image_bytes <= vmem_budget_bytes:
        # Full-HW contiguous blocks; fold batch into the block for small images.
        nb = max(1, min(n, vmem_budget_bytes // per_image_bytes))
        if n > 1:
            # Keep >= 2 grid steps so both v7x TensorCores get work.
            nb = min(nb, pl.cdiv(n, 2))
        t = hw
        grid = (pl.cdiv(n, nb), 1)
        if n == 1 and hw >= 256:
            # Single image: split HW into 2 parallel chunks for v7x's 2 TCs.
            t = max(128, ((pl.cdiv(hw, 2) + 127) // 128) * 128)
            grid = (1, pl.cdiv(hw, t))
    else:
        # Large images: biggest 128-multiple lane tile that keeps
        # double-buffered in+out inside the VMEM budget.
        nb = 1
        t = max(128, (vmem_budget_bytes // bytes_per_lane) // 128 * 128)
        t = min(t, hw)
        grid = (n, pl.cdiv(hw, t))

    cost = pl.CostEstimate(
        flops=2 * n * cout * cin * hw,
        transcendentals=0,
        bytes_accessed=itemsize * (n * hw * (cin + cout) + cout * cin),
    )

    out_flat = pl.pallas_call(
        _conv1x1_kernel,
        out_shape=jax.ShapeDtypeStruct((n, cout, hw), x_nchw.dtype),
        grid_spec=pltpu.PrefetchScalarGridSpec(
            num_scalar_prefetch=0,
            grid=grid,
            in_specs=[
                # Weight: constant block index -> loaded once, VMEM-resident.
                pl.BlockSpec((cout, cin), lambda b, j: (0, 0)),
                # Input block: (Nb, Cin, T), lane axis = spatial.
                pl.BlockSpec((nb, cin, t), lambda b, j: (b, 0, j)),
            ],
            out_specs=pl.BlockSpec((nb, cout, t), lambda b, j: (b, 0, j)),
        ),
        compiler_params=pltpu.CompilerParams(
            dimension_semantics=("parallel", "parallel"),
        ),
        cost_estimate=cost,
    )(w_mat, x_flat)

    # Free reshape back to NCHW (no transpose needed).
    return out_flat.reshape(n, cout, h, w)


if __name__ == "__main__":
    key = jax.random.PRNGKey(0)
    k_x, k_w, k_x2 = jax.random.split(key, 3)

    # Deterministic weight init (kaiming-uniform-like bound, as in nn.Conv2d).
    C = 24
    fan_in = C * 1 * 1
    bound = (1.0 / fan_in) ** 0.5
    weight = jax.random.uniform(
        k_w, (C, C, 1, 1), dtype=jnp.float32, minval=-bound, maxval=bound
    )
    w_mat = weight.reshape(C, C)

    # Small test shape (batch-fold path): N=2, H=W=16.
    x_small = jax.random.normal(k_x, (2, C, 16, 16), dtype=jnp.float32)
    out_small = jax.block_until_ready(conv1x1_pallas(x_small, weight))
    ref_small = jnp.einsum("nchw,oc->nohw", x_small, w_mat)
    assert out_small.shape == (2, C, 16, 16)
    assert jnp.allclose(out_small, ref_small, atol=1e-4, rtol=1e-4)

    # Module's actual shape (N=1 -> HW-split path): (1, 24, 56, 56).
    x_spec = jax.random.normal(k_x2, (1, C, 56, 56), dtype=jnp.float32)
    out_spec = jax.block_until_ready(conv1x1_pallas(x_spec, weight))
    ref_spec = jnp.einsum("nchw,oc->nohw", x_spec, w_mat)
    assert out_spec.shape == (1, C, 56, 56)
    assert jnp.allclose(out_spec, ref_spec, atol=1e-4, rtol=1e-4)

    print("KERNEL_OK")
</pallas_src>

<mosaic_0001>
module attributes {stable_mosaic.version = 11 : i64} {
  func.func @_conv1x1_kernel(%arg0: i32, %arg1: i32, %arg2: memref<24x24xf32, #tpu.memory_space<vmem>>, %arg3: memref<1x24x256xf32, #tpu.memory_space<vmem>>, %arg4: memref<1x24x256xf32, #tpu.memory_space<vmem>>) attributes {dimension_semantics = [#tpu.dimension_semantics<parallel>, #tpu.dimension_semantics<parallel>], iteration_bounds = array<i64: 2, 1>, scalar_prefetch = 0 : i64, scratch_operands = 0 : i64, tpu.core_type = #tpu.core_type<tc>, window_params = [{pipeline_mode = #tpu.pipeline_mode<synchronous>, transform_indices = @transform_0, window_bounds = array<i64: 24, 24>}, {transform_indices = @transform_1, window_bounds = array<i64: 1, 24, 256>}, {transform_indices = @transform_2, window_bounds = array<i64: 1, 24, 256>}]} {
    %c0 = arith.constant 0 : index
    %c0_0 = arith.constant 0 : index
    %0 = vector.load %arg2[%c0, %c0_0] : memref<24x24xf32, #tpu.memory_space<vmem>>, vector<24x24xf32>
    %c0_1 = arith.constant 0 : index
    %c0_2 = arith.constant 0 : index
    %c0_3 = arith.constant 0 : index
    %1 = vector.load %arg3[%c0_1, %c0_2, %c0_3] : memref<1x24x256xf32, #tpu.memory_space<vmem>>, vector<1x24x256xf32>
    %2 = vector.shape_cast %1 : vector<1x24x256xf32> to vector<24x256xf32>
    %cst = arith.constant dense<0.000000e+00> : vector<24x256xf32>
    %3 = tpu.matmul %0, %2, %cst {dimension_numbers = #tpu.dot_dimension_numbers<[1], [0], [0], [1], [0, 0, 1, 1], [], []>} : vector<24x24xf32>, vector<24x256xf32>, vector<24x256xf32> -> vector<24x256xf32>
    %c0_4 = arith.constant 0 : index
    %c0_5 = arith.constant 0 : index
    %c0_6 = arith.constant 0 : index
    %4 = vector.load %arg4[%c0_4, %c0_5, %c0_6] : memref<1x24x256xf32, #tpu.memory_space<vmem>>, vector<1x24x256xf32>
    %5 = vector.shape_cast %4 : vector<1x24x256xf32> to vector<24x256xf32>
    %6 = vector.shape_cast %3 : vector<24x256xf32> to vector<1x24x256xf32>
    tpu.vector_store %arg4[%c0_4, %c0_5, %c0_6], %6 {strides = array<i32>} : memref<1x24x256xf32, #tpu.memory_space<vmem>>, vector<1x24x256xf32>,
    return
  }
  func.func @transform_0(%arg0: i32, %arg1: i32) -> (i32, i32) {
    %c0_i32 = arith.constant 0 : i32
    %c0_i32_0 = arith.constant 0 : i32
    %c0_i32_1 = arith.constant 0 : i32
    return %c0_i32, %c0_i32_0 : i32, i32
  }
  func.func @transform_1(%arg0: i32, %arg1: i32) -> (i32, i32, i32) {
    %c0_i32 = arith.constant 0 : i32
    %c0_i32_0 = arith.constant 0 : i32
    return %arg0, %c0_i32, %arg1 : i32, i32, i32
  }
  func.func @transform_2(%arg0: i32, %arg1: i32) -> (i32, i32, i32) {
    %c0_i32 = arith.constant 0 : i32
    %c0_i32_0 = arith.constant 0 : i32
    return %arg0, %c0_i32, %arg1 : i32, i32, i32
  }
}

</mosaic_0001>

<bundles_post_ra>
// kernel: tpu_custom_call.1
= control target key start
LH: loop header
LB: loop body
LE: loop exit
PB: predicated region body
PF: predicated region fallthrough
CT: control target
= control target key end

     0   :  { %7 = vsyncpa [#allocation3], 0  ;;  %s818_s0 = inlined_call_operand.hbm [shape: f32[24,24], index: 0, kind: input, shape index: {}]   ;;  %s819_s1 = inlined_call_operand.hbm [shape: f32[2,24,256], index: 1, kind: input, shape index: {}]   ;;  %s820_s2 = inlined_call_operand.hbm [shape: f32[2,24,256], index: 2, kind: output, shape index: {}]  }
   0x1   :  { %8 = vsyncpa [#allocation6], 0 }
   0x2   :  { %10 = vsyncpa [#allocation6 + $0x1], 0 }
   0x3   :  { %11 = vsyncpa [#allocation4], 0 }
   0x4   :  { %13 = vsyncpa [#allocation4 + $0x1], 0  ;;  %s671_s9 = smov 0   ;;  %s673_s10 = smov 0  }
   0x5   :  { %s675_s11 = smov 0   ;;  %s677_s12 = smov 0  }
   0x6   :  { %s679_s13 = smov 0   ;;  %s681_s14 = smov 0  }
   0x7 LB: > { %s395_s15 = sadd.s32 4294967295, %s647_s14   ;;  %s396_s16 = sadd.s32 4294967294, %s647_s14   ;;  %s647_s14 = sphi %s681_s14, %s19_s14   ;;  %s643_s13 = sphi %s679_s13, %s831_s13   ;;  %s639_s12 = sphi %s677_s12, %s830_s12   ;;  %s635_s11 = sphi %s675_s11, %s829_s11   ;;  %s631_s10 = sphi %s673_s10, %s828_s10   ;;  %s627_s9 = sphi %s671_s9, %s827_s9  }
   0x8   : > { %p74_p0 = scmp.ne.s32.totalorder %s631_s10, %s627_s9  ;;  %p705_p1 = scmp.eq.s32.totalorder %s395_s15, 0 }
   0x9   : > { %p709_p2 = scmp.eq.s32.totalorder %s395_s15, 1  ;;  %p106_p3 = scmp.eq.s32.totalorder %s396_s16, 1 }
   0xa   : > { %p715_p4 = por %p705_p1, %p74_p0  ;;  %p397_p5 = scmp.ge.s32.totalorder %s647_s14, 1 }
   0xb   : > { %p720_p6 = por %p106_p3, %p74_p0  ;;  %p113_p7 = scmp.lt.s32.totalorder %s647_s14, 3 }
   0xc   : > { %s124_s23 = sshll.u32 %s818_s0, 4  ;;  %s649_s25 = smov [#allocation2]   ;;  %s125_s23 = int_to_ptr.hbm [resolvable:$true] %s124_s23 }
   0xd   : > { %p728_p8 = pnand %p397_p5, %p113_p7  ;;  %s126_s26 = sshll.u32 %s649_s25, 4  ;;  %s127_s26 = int_to_ptr.vmem [resolvable:$true] %s126_s26 }
   0xe   : > { %p399_p11 = scmp.ge.s32.totalorder %s647_s14, 2  ;;  %s650_s27 = smov 128  }
   0xf   : > { %p430_p9 = pneg %p728_p8  ;;  %s651_s28 = smov 8  }
  0x10   : > { %s31_s29 = sadd.s32 1, %s643_s13  ;;  %s61_s30 = sadd.s32 1, %s635_s11 }
  0x11   : > { %p431_p10 = pnand %p430_p9, %p705_p1  ;;  %p33_p12 = scmp.ge.s32.totalorder %s31_s29, 2 }
  0x12   : > { %p68_p13 = scmp.ne.s32.totalorder %s635_s11, %s631_s10  ;;  %p69_p0 = scmp.eq.s32.totalorder %s647_s14, 0 }
  0x13   : > { %433 = dma.hbm_to_vmem [thread:$0]  (!%p431_p10), %s125_s23, 384, %s127_s26, [#allocation3], %s650_s27, %s650_s27, %s651_s28  }
  0x14   : > { %s833_s29 = smov (%p33_p12, %s31_s29), 0  ;;  %p70_p3 = por %p69_p0, %p68_p13 }
  0x15   : > { %p746_p5 = por %p709_p2, %p68_p13  ;;  %s56_s4 = ssub.s32 %s643_s13, %s833_s29 }
  0x16   : > { %p443_p7 = scmp.lt.s32.totalorder %s647_s14, 2  ;;  %p59_p9 = scmp.eq.s32.totalorder %s56_s4, 0 }
  0x17   : > { %s140_s5 = sand.u32 1, %s635_s11   ;;  %s419_s8 = smul.u32 48, %s643_s13 }
  0x18   : > { %s418_s6 = smul.u32 48, %s140_s5  ;;  %p435_p10 = pnand %p443_p7, %p70_p3 }
  0x19   : > { %s755_s7 = scalar_select %p59_p9, %s635_s11, %s61_s30  }
  0x1a   : > { %s144_s15 = scalar_lea.vmem [#allocation5], %s418_s6  ;;  %s151_s23 = scalar_lea.hbm %s819_s1, %s419_s8 }
  0x1b   : > { %s154_s16 = sshll.u32 %s144_s15, 4  ;;  %s152_s18 = sshll.u32 %s151_s23, 4  ;;  %s155_s16 = int_to_ptr.vmem [resolvable:$true] %s154_s16  ;;  %s153_s18 = int_to_ptr.hbm [resolvable:$true] %s152_s18 }
  0x1c   : > { %s141_s25 = scalar_lea.sflag [#allocation6], %s140_s5  ;;  %s652_s26 = smov 256  }
  0x1d   : > { %s653_s27 = smov 16   ;;  %166 = sbr.rel (%p728_p8) target bundleno = 191 (0xbf), region = 28 }
  0x1e   : > { %437 = dma.hbm_to_vmem [thread:$0]  (!%p435_p10), %s153_s18, 768, %s155_s16, %s141_s25, %s652_s26, %s652_s26, %s653_s27  }
  0x22   : > { %614 = dma.done.wait (%p705_p1), [#allocation3], 384  }
  0x23   : > { %616 = vsyncadd (%p705_p1), [#allocation3], 4294966912  ;;  %s768_s28 = sand.u32 1, %s631_s10  }
  0x24   : > { %s420_s30 = smul.u32 48, %s768_s28  ;;  %s174_s4 = scalar_lea.sflag [#allocation6], %s768_s28 }
  0x26   : > { %s177_s5 = scalar_lea.vmem [#allocation5], %s420_s30 }
  0x27   : > { %618 = dma.done.wait (%p715_p4), %s174_s4, 768  }
  0x28   : > { %620 = vsyncadd (%p715_p4), %s174_s4, 4294966528  ;;  %v208_v0 = vld [vmem:[%s177_s5 + $0x20] sm:$0xff]  ;;  %v209_v1 = vld [vmem:[%s177_s5 + $0x28] sm:$0xff]  ;;  %vm210_vm0 = vcmask 195584   ;;  %s198_s17 = scalar_lea.vmem [#allocation7], %s420_s30  ;;  %s421_s19 = smul.u32 48, %s639_s12 }
  0x29   : > { %v206_v2 = vld [vmem:[%s177_s5 + $0x10] sm:$0xff]  ;;  %412 = vmatpush.msra.mxu2 %v208_v0  ;;  %415 = vmatpush.msra.mxu3 %v209_v1  ;;  %v207_v3 = vld [vmem:[%s177_s5 + $0x18] sm:$0xff]  ;;  %v204_v4 = vld [vmem:[%s177_s5] sm:$0xff]  ;;  %s293_s15 = sshll.u32 %s198_s17, 4  ;;  %s279_s21 = scalar_lea.sflag [#allocation4], %s768_s28  ;;  %s294_s15 = int_to_ptr.vmem [resolvable:$true] %s293_s15 }
  0x2a   : > { %v205_v5 = vld [vmem:[%s177_s5 + $0x8] sm:$0xff]  ;;  %233 = vmatpush.msra.mxu0 %v208_v0  ;;  %259 = vmatpush.msra.mxu1 %v209_v1  ;;  %v202_v6 = vld [vmem:[#allocation2 + $0x8] sm:$0xff]  ;;  %s292_s8 = scalar_lea.hbm %s820_s2, %s421_s19  ;;  %s581_s25 = scalar_lea.hbm %s820_s2, 96 }
  0x2b   : > { %413 = vmatpush.msra.mxu2 %v206_v2  ;;  %416 = vmatpush.msra.mxu3 %v207_v3  ;;  %v201_v7 = vld [vmem:[#allocation2] sm:$0xff]  ;;  %v203_v8 = vld [vmem:[#allocation2 + $0x10] sm:$0xff]  ;;  %s295_s16 = sshll.u32 %s292_s8, 4  ;;  %s296_s16 = int_to_ptr.hbm [resolvable:$true] %s295_s16 }
  0x2c   : > { %234 = vmatpush.msra.mxu0 %v206_v2  ;;  %260 = vmatpush.msra.mxu1 %v207_v3  ;;  %s575_s12 = sshra.s32 %s296_s16, 4  ;;  %s576_s12 = int_to_ptr.hbm [resolvable:$true] %s575_s12 }
  0x2d   : > { %414 = vmatpush.msra.mxu2 %v204_v4  ;;  %417 = vmatpush.msra.mxu3 %v205_v5  ;;  %s577_s22 = scalar_lea.hbm %s576_s12, 48  ;;  %p582_p8 = scmp.lt.s32.totalorder %s576_s12, %s820_s2 }
  0x2e   : > { %404 = vmatmul.msk.f32.vlgmr.msra.gmra.mxu2 %vm210_vm0, %v202_v6  ;;  %407 = vmatmul.msk.f32.vlgmr.msra.gmra.mxu3 %vm210_vm0, %v202_v6  ;;  %p578_p1 = scmp.ne.s32.totalorder %s576_s12, %s577_s22  ;;  %p583_p12 = scmp.lt.s32.totalorder %s581_s25, %s577_s22 }
  0x2f   : > { %235 = vmatpush.msra.mxu0 %v204_v4  ;;  %261 = vmatpush.msra.mxu1 %v205_v5 }
  0x30   : > { %403 = vmatmul.msk.f32.vlgmr.msra.gmra.mxu0 %vm210_vm0, %v201_v7  ;;  %406 = vmatmul.msk.f32.vlgmr.msra.gmra.mxu1 %vm210_vm0, %v201_v7  ;;  %p579_p2 = pnand %p578_p1, %p746_p5  ;;  %p584_p13 = por %p583_p12, %p582_p8 }
  0x32   : > { %p580_p4 = pneg %p579_p2 }
  0x34   : > { %p585_p0 = pnand %p584_p13, %p580_p4 }
  0x36   : > { %405 = vmatmul.msk.f32.gmra.mxu2 %vm210_vm0, %v203_v8  ;;  %408 = vmatmul.msk.f32.gmra.mxu3 %vm210_vm0, %v203_v8 }
  0xad   : > { %v237_v9 = vpop.f32.mrf.mxu0  ;;  %v263_v10 = vpop.f32.mrf.mxu1 }
  0xae   : > { %272 = vst [vmem:[%s198_s17] sm:$0xff] %v237_v9 }
  0xaf   : > { %273 = vst [vmem:[%s198_s17 + $0x8] sm:$0xff] %v263_v10 }
  0xb1   : > { %v240_v11 = vpop.f32.mrf.mxu2  ;;  %v266_v12 = vpop.f32.mrf.mxu3 }
  0xb2   : > { %274 = vst [vmem:[%s198_s17 + $0x10] sm:$0xff] %v240_v11 }
  0xb3   : > { %275 = vst [vmem:[%s198_s17 + $0x18] sm:$0xff] %v266_v12 }
  0xb9   : > { %v243_v13 = vpop.f32.mrf.mxu2  ;;  %v269_v14 = vpop.f32.mrf.mxu3 }
  0xba   : > { %276 = vst [vmem:[%s198_s17 + $0x20] sm:$0xff] %v243_v13 }
  0xbb   : > { %277 = vst [vmem:[%s198_s17 + $0x28] sm:$0xff] %v269_v14 }
  0xbc   : > { %588 = shalt.err (!%p585_p0)
}
  0xbd   : > { %s654_s28 = smov 256   ;;  %s655_s30 = smov 16  }
  0xbe   : > { %428 = dma.vmem_to_hbm [thread:$0]  (%p746_p5), %s294_s15, 768, %s296_s16, %s279_s21, %s654_s28, %s654_s28, %s655_s30  }
  0xbf PF: > { %s310_s4 = sand.u32 1, %s627_s9   ;;  %p439_p3 = pnand %p399_p11, %p720_p6 }
  0xc0   : > { %s311_s5 = scalar_lea.sflag [#allocation4], %s310_s4 }
  0xc1   : > { %p440_p7 = pneg %p439_p3 }
  0xc3   : > { %622 = dma.done.wait (%p440_p7), %s311_s5, 768  }
  0xc4   : > { %624 = vsyncadd (%p440_p7), %s311_s5, 4294966528  ;;  %s19_s14 = sadd.s32 1, %s647_s14   ;;  %s827_s9 = smov %s631_s10 }
  0xc5   : > { %p16_p9 = scmp.ge.s32.totalorder %s19_s14, 4   ;;  %s828_s10 = smov %s635_s11 }
  0xc6   : > { %s829_s11 = smov %s755_s7  ;;  %s830_s12 = smov %s643_s13 }
  0xc7   : > { %s831_s13 = smov %s833_s29  ;;  %18 = sbr.rel (!%p16_p9) target bundleno = 7 (0x7), region = 78 }
  0xcc   :  { %317 = vsyncpa [#allocation3], 1 }
  0xcd   :  { %319 = vsyncpa [#allocation3 + $0x1], 1 }
  0xce   :  { %320 = vsyncpa [#allocation6], 1 }
  0xcf   :  { %322 = vsyncpa [#allocation6 + $0x1], 1 }
  0xd0   :  { %323 = vsyncpa [#allocation4], 1 }
  0xd1   :  { %325 = vsyncpa [#allocation4 + $0x1], 1 }

</bundles_post_ra>
